<compile_context>
chip_gen: v5e
topology: v5e:2x2
jax: 0.10.0
libtpu: 0.0.40
codegen_flags: <defaults>
</compile_context>

<pallas_src>
import functools

import jax
import jax.numpy as jnp
from jax import lax
from jax.experimental import pallas as pl
from jax.experimental.pallas import tpu as pltpu

BN_EPS = 1e-5
LANE = 128


def _round_up(x, m):
    return (x + m - 1) // m * m


def srrl_kernel(x_ref, wconv_ref, gamma_ref, beta_ref, wcls_ref, bcls_ref,
                trans_ref, pred_ref, *, inv_b):
    """One t_n channel tile per grid step. pred_ref is a resident accumulator."""
    j = pl.program_id(0)

    # --- conv1x1 == matmul: bf16 operands, f32 MXU accumulation ---
    y = jnp.dot(x_ref[...], wconv_ref[...],
                preferred_element_type=jnp.float32)            # (Bp, TN) f32

    # --- BatchNorm2d, one-pass batch stats (biased variance) ---
    # Padded batch rows of x are zero -> zero rows of y -> contribute 0 to the
    # sums; divide by the *real* batch size via inv_b.
    s = jnp.sum(y, axis=0, keepdims=True)                      # (1, TN)
    ss = jnp.sum(y * y, axis=0, keepdims=True)                 # (1, TN)
    mean = s * inv_b
    var = ss * inv_b - mean * mean
    inv_std = lax.rsqrt(var + BN_EPS)

    # Fold affine into per-channel scale/shift: 1 mul + 1 add per element.
    scale = gamma_ref[...] * inv_std                           # (1, TN)
    shift = beta_ref[...] - mean * scale                       # (1, TN)

    # --- ReLU ---
    t = jnp.maximum(y * scale + shift, 0.0)                    # (Bp, TN) f32
    trans_ref[...] = t.astype(trans_ref.dtype)

    # --- teacher classifier partial product for this channel tile ---
    part = jnp.dot(t.astype(jnp.bfloat16), wcls_ref[...],
                   preferred_element_type=jnp.float32)         # (Bp, Cp) f32

    @pl.when(j == 0)
    def _():
        # Fuse the classifier bias into the first partial (single pass).
        pred_ref[...] = part + bcls_ref[...]

    @pl.when(j > 0)
    def _():
        pred_ref[...] += part


def _pick_tile(bp, sp, cp, t_n, vmem_budget=48 * 1024 * 1024):
    """Largest lane-multiple channel tile whose (double-buffered) working set
    fits a conservative VMEM budget."""
    for tile in (512, 256, 128):
        tp = _round_up(t_n, tile)
        # bf16 operand buffers are double-buffered by the pipeline; f32 pred
        # accumulator + f32 trans tile + f32 y/t temporaries.
        vmem = (2 * bp * sp * 2            # x (resident, 2 bufs)
                + 2 * sp * tile * 2        # w_conv tile
                + 2 * tile * cp * 2        # w_cls tile
                + 2 * 2 * tile * 4         # gamma/beta tiles
                + 2 * cp * 4               # b_cls
                + 2 * bp * tile * 4        # trans tile (out, 2 bufs)
                + bp * cp * 4              # pred accumulator
                + 3 * bp * tile * 4)       # y / t / scratch headroom
        if vmem <= vmem_budget:
            return tile, tp
    return 128, _round_up(t_n, 128)


def srrl_forward(feat_s, w_conv, gamma, beta, w_cls, b_cls, *, tn_tile=None):
    """feat_s: (B, s_n); w_conv: (s_n, t_n); gamma/beta: (1, t_n);
    w_cls: (t_n, C); b_cls: (1, C). Returns (trans_feat_s (B,t_n), pred (B,C))."""
    B, s_n = feat_s.shape
    t_n = w_conv.shape[1]
    n_cls = w_cls.shape[1]

    # Lane/MXU-friendly padded sizes (zero padding is semantics-preserving).
    bp = _round_up(B, 8)                       # sublane multiple
    sp = _round_up(s_n, LANE)                  # K1, lane dim of x
    cp = _round_up(n_cls, LANE)                # lane-dense pred stores
    if tn_tile is None:
        tn_tile, tp = _pick_tile(bp, sp, cp, t_n)
    else:
        tp = _round_up(t_n, tn_tile)
    n_tiles = tp // tn_tile

    f32, bf16 = jnp.float32, jnp.bfloat16

    # Pad + cast matmul operands to bf16 (f32 accumulation in-kernel).
    x_p = jnp.zeros((bp, sp), f32).at[:B, :s_n].set(
        feat_s.astype(f32)).astype(bf16)
    wconv_p = jnp.zeros((sp, tp), f32).at[:s_n, :t_n].set(
        w_conv.astype(f32)).astype(bf16)
    gamma_p = jnp.ones((1, tp), f32).at[:, :t_n].set(
        gamma.astype(f32).reshape(1, t_n))
    beta_p = jnp.zeros((1, tp), f32).at[:, :t_n].set(
        beta.astype(f32).reshape(1, t_n))
    wcls_p = jnp.zeros((tp, cp), f32).at[:t_n, :n_cls].set(
        w_cls.astype(f32)).astype(bf16)
    bcls_p = jnp.zeros((1, cp), f32).at[:, :n_cls].set(
        b_cls.astype(f32).reshape(1, n_cls))

    grid_spec = pltpu.PrefetchScalarGridSpec(
        num_scalar_prefetch=0,
        grid=(n_tiles,),
        in_specs=[
            pl.BlockSpec((bp, sp), lambda j: (0, 0)),        # x (resident)
            pl.BlockSpec((sp, tn_tile), lambda j: (0, j)),   # w_conv tile
            pl.BlockSpec((1, tn_tile), lambda j: (0, j)),    # gamma tile
            pl.BlockSpec((1, tn_tile), lambda j: (0, j)),    # beta tile
            pl.BlockSpec((tn_tile, cp), lambda j: (j, 0)),   # w_cls tile
            pl.BlockSpec((1, cp), lambda j: (0, 0)),         # b_cls (resident)
        ],
        out_specs=(
            pl.BlockSpec((bp, tn_tile), lambda j: (0, j)),   # trans tile
            pl.BlockSpec((bp, cp), lambda j: (0, 0)),        # pred accumulator
        ),
    )

    flops = 2 * bp * sp * tp + 2 * bp * tp * cp
    bytes_accessed = (x_p.size * 2 + wconv_p.size * 2 + wcls_p.size * 2
                      + (gamma_p.size + beta_p.size + bcls_p.size) * 4
                      + bp * tp * 4 + bp * cp * 4)

    trans_p, pred_p = pl.pallas_call(
        functools.partial(srrl_kernel, inv_b=1.0 / B),
        grid_spec=grid_spec,
        out_shape=(jax.ShapeDtypeStruct((bp, tp), f32),
                   jax.ShapeDtypeStruct((bp, cp), f32)),
        compiler_params=pltpu.CompilerParams(
            # pred accumulates across the channel-tile axis -> "arbitrary".
            dimension_semantics=("arbitrary",),
            vmem_limit_bytes=64 * 1024 * 1024),
        cost_estimate=pl.CostEstimate(flops=flops, transcendentals=tp,
                                      bytes_accessed=bytes_accessed),
    )(x_p, wconv_p, gamma_p, beta_p, wcls_p, bcls_p)

    return trans_p[:B, :t_n], pred_p[:B, :n_cls]


def srrl_reference(feat_s, w_conv, gamma, beta, w_cls, b_cls):
    """Mirrors the module math (bf16 matmul operands / f32 accumulation,
    classic two-pass BN in f32) for verification."""
    y = jnp.dot(feat_s.astype(jnp.bfloat16), w_conv.astype(jnp.bfloat16),
                preferred_element_type=jnp.float32)
    mean = jnp.mean(y, axis=0, keepdims=True)
    var = jnp.mean((y - mean) ** 2, axis=0, keepdims=True)
    y_bn = (y - mean) / jnp.sqrt(var + BN_EPS) * gamma + beta
    t = jnp.maximum(y_bn, 0.0)
    pred = jnp.dot(t.astype(jnp.bfloat16), w_cls.astype(jnp.bfloat16),
                   preferred_element_type=jnp.float32) + b_cls
    return t, pred


if __name__ == "__main__":
    # Small deterministic setup; t_n=512 exercises the multi-step channel-tiled
    # grid and the pred accumulation path.
    B, s_n, t_n, n_cls = 8, 128, 512, 16

    key = jax.random.PRNGKey(0)
    k_feat, k_conv, k_wcls, k_bcls = jax.random.split(key, 4)

    feat_s = jax.random.normal(k_feat, (B, s_n), dtype=jnp.float32)
    # Conv2d(s_n, t_n, 1, bias=False) weight (t_n, s_n, 1, 1) stored as (s_n, t_n)
    w_conv = (jax.random.normal(k_conv, (s_n, t_n), dtype=jnp.float32)
              * (1.0 / jnp.sqrt(s_n)))
    # BatchNorm2d default init
    gamma = jnp.ones((1, t_n), dtype=jnp.float32)
    beta = jnp.zeros((1, t_n), dtype=jnp.float32)
    # cls_t ~ Linear(t_n, n_cls): weight (n_cls, t_n) stored as (t_n, n_cls)
    w_cls = (jax.random.normal(k_wcls, (t_n, n_cls), dtype=jnp.float32)
             * (1.0 / jnp.sqrt(t_n)))
    b_cls = 0.01 * jax.random.normal(k_bcls, (1, n_cls), dtype=jnp.float32)

    trans_feat_s, pred_feat_s = srrl_forward(feat_s, w_conv, gamma, beta,
                                             w_cls, b_cls)
    jax.block_until_ready((trans_feat_s, pred_feat_s))

    ref_trans, ref_pred = srrl_reference(feat_s, w_conv, gamma, beta,
                                         w_cls, b_cls)
    assert trans_feat_s.shape == (B, t_n) and pred_feat_s.shape == (B, n_cls)
    assert jnp.allclose(trans_feat_s, ref_trans, atol=1e-2, rtol=1e-2), (
        float(jnp.max(jnp.abs(trans_feat_s - ref_trans))))
    assert jnp.allclose(pred_feat_s, ref_pred, atol=1e-2, rtol=1e-2), (
        float(jnp.max(jnp.abs(pred_feat_s - ref_pred))))

    print("KERNEL_OK")
</pallas_src>

<mosaic_0001>
module attributes {stable_mosaic.version = 11 : i64} {
  func.func @srrl_kernel(%arg0: i32, %arg1: memref<8x128xbf16, #tpu.memory_space<vmem>>, %arg2: memref<128x512xbf16, #tpu.memory_space<vmem>>, %arg3: memref<1x512xf32, #tpu.memory_space<vmem>>, %arg4: memref<1x512xf32, #tpu.memory_space<vmem>>, %arg5: memref<512x128xbf16, #tpu.memory_space<vmem>>, %arg6: memref<1x128xf32, #tpu.memory_space<vmem>>, %arg7: memref<8x512xf32, #tpu.memory_space<vmem>>, %arg8: memref<8x128xf32, #tpu.memory_space<vmem>>) attributes {dimension_semantics = [#tpu.dimension_semantics<arbitrary>], iteration_bounds = array<i64: 1>, scalar_prefetch = 0 : i64, scratch_operands = 0 : i64, tpu.core_type = #tpu.core_type<tc>, window_params = [{pipeline_mode = #tpu.pipeline_mode<synchronous>, transform_indices = @transform_0, window_bounds = array<i64: 8, 128>}, {transform_indices = @transform_1, window_bounds = array<i64: 128, 512>}, {transform_indices = @transform_2, window_bounds = array<i64: 1, 512>}, {transform_indices = @transform_3, window_bounds = array<i64: 1, 512>}, {transform_indices = @transform_4, window_bounds = array<i64: 512, 128>}, {pipeline_mode = #tpu.pipeline_mode<synchronous>, transform_indices = @transform_5, window_bounds = array<i64: 1, 128>}, {transform_indices = @transform_6, window_bounds = array<i64: 8, 512>}, {pipeline_mode = #tpu.pipeline_mode<synchronous>, transform_indices = @transform_7, window_bounds = array<i64: 8, 128>}]} {
    %c0 = arith.constant 0 : index
    %c0_0 = arith.constant 0 : index
    %0 = vector.load %arg1[%c0, %c0_0] : memref<8x128xbf16, #tpu.memory_space<vmem>>, vector<8x128xbf16>
    %c0_1 = arith.constant 0 : index
    %c0_2 = arith.constant 0 : index
    %1 = vector.load %arg2[%c0_1, %c0_2] : memref<128x512xbf16, #tpu.memory_space<vmem>>, vector<128x512xbf16>
    %cst = arith.constant dense<0.000000e+00> : vector<8x512xf32>
    %2 = tpu.matmul %0, %1, %cst {dimension_numbers = #tpu.dot_dimension_numbers<[1], [0], [0], [1], [0, 0, 1, 1], [], []>} : vector<8x128xbf16>, vector<128x512xbf16>, vector<8x512xf32> -> vector<8x512xf32>
    %cst_3 = arith.constant dense<0.000000e+00> : vector<512xf32>
    %3 = vector.multi_reduction <add>, %2, %cst_3 [0] : vector<8x512xf32> to vector<512xf32>
    %4 = vector.shape_cast %3 : vector<512xf32> to vector<1x512xf32>
    %5 = arith.mulf %2, %2 : vector<8x512xf32>
    %cst_4 = arith.constant dense<0.000000e+00> : vector<512xf32>
    %6 = vector.multi_reduction <add>, %5, %cst_4 [0] : vector<8x512xf32> to vector<512xf32>
    %7 = vector.shape_cast %6 : vector<512xf32> to vector<1x512xf32>
    %cst_5 = arith.constant 1.250000e-01 : f32
    %8 = vector.broadcast %cst_5 : f32 to vector<1x512xf32>
    %9 = arith.mulf %4, %8 : vector<1x512xf32>
    %cst_6 = arith.constant 1.250000e-01 : f32
    %10 = vector.broadcast %cst_6 : f32 to vector<1x512xf32>
    %11 = arith.mulf %7, %10 : vector<1x512xf32>
    %12 = arith.mulf %9, %9 : vector<1x512xf32>
    %13 = arith.subf %11, %12 : vector<1x512xf32>
    %cst_7 = arith.constant 9.99999974E-6 : f32
    %14 = vector.broadcast %cst_7 : f32 to vector<1x512xf32>
    %15 = arith.addf %13, %14 : vector<1x512xf32>
    %16 = math.rsqrt %15 : vector<1x512xf32>
    %c0_8 = arith.constant 0 : index
    %c0_9 = arith.constant 0 : index
    %17 = vector.load %arg3[%c0_8, %c0_9] : memref<1x512xf32, #tpu.memory_space<vmem>>, vector<1x512xf32>
    %18 = arith.mulf %17, %16 : vector<1x512xf32>
    %c0_10 = arith.constant 0 : index
    %c0_11 = arith.constant 0 : index
    %19 = vector.load %arg4[%c0_10, %c0_11] : memref<1x512xf32, #tpu.memory_space<vmem>>, vector<1x512xf32>
    %20 = arith.mulf %9, %18 : vector<1x512xf32>
    %21 = arith.subf %19, %20 : vector<1x512xf32>
    %22 = vector.broadcast %18 : vector<1x512xf32> to vector<8x512xf32>
    %23 = arith.mulf %2, %22 : vector<8x512xf32>
    %24 = vector.broadcast %21 : vector<1x512xf32> to vector<8x512xf32>
    %25 = arith.addf %23, %24 : vector<8x512xf32>
    %cst_12 = arith.constant 0.000000e+00 : f32
    %26 = vector.broadcast %cst_12 : f32 to vector<8x512xf32>
    %27 = arith.maximumf %25, %26 : vector<8x512xf32>
    %c0_13 = arith.constant 0 : index
    %c0_14 = arith.constant 0 : index
    %28 = vector.load %arg7[%c0_13, %c0_14] : memref<8x512xf32, #tpu.memory_space<vmem>>, vector<8x512xf32>
    tpu.vector_store %arg7[%c0_13, %c0_14], %27 {strides = array<i32>} : memref<8x512xf32, #tpu.memory_space<vmem>>, vector<8x512xf32>,
    %29 = arith.truncf %27 : vector<8x512xf32> to vector<8x512xbf16>
    %c0_15 = arith.constant 0 : index
    %c0_16 = arith.constant 0 : index
    %30 = vector.load %arg5[%c0_15, %c0_16] : memref<512x128xbf16, #tpu.memory_space<vmem>>, vector<512x128xbf16>
    %cst_17 = arith.constant dense<0.000000e+00> : vector<8x128xf32>
    %31 = tpu.matmul %29, %30, %cst_17 {dimension_numbers = #tpu.dot_dimension_numbers<[1], [0], [0], [1], [0, 0, 1, 1], [], []>} : vector<8x512xbf16>, vector<512x128xbf16>, vector<8x128xf32> -> vector<8x128xf32>
    %c0_i32 = arith.constant 0 : i32
    %32 = arith.cmpi eq, %arg0, %c0_i32 : i32
    %33 = arith.extui %32 : i1 to i32
    %c0_i32_18 = arith.constant 0 : i32
    %34 = arith.cmpi ne, %33, %c0_i32_18 : i32
    scf.if %34 {
      %c0_21 = arith.constant 0 : index
      %c0_22 = arith.constant 0 : index
      %38 = vector.load %arg6[%c0_21, %c0_22] : memref<1x128xf32, #tpu.memory_space<vmem>>, vector<1x128xf32>
      %39 = vector.broadcast %38 : vector<1x128xf32> to vector<8x128xf32>
      %40 = arith.addf %31, %39 : vector<8x128xf32>
      %c0_23 = arith.constant 0 : index
      %c0_24 = arith.constant 0 : index
      %41 = vector.load %arg8[%c0_23, %c0_24] : memref<8x128xf32, #tpu.memory_space<vmem>>, vector<8x128xf32>
      tpu.vector_store %arg8[%c0_23, %c0_24], %40 {strides = array<i32>} : memref<8x128xf32, #tpu.memory_space<vmem>>, vector<8x128xf32>,
    } else {
    }
    %c0_i32_19 = arith.constant 0 : i32
    %35 = arith.cmpi sgt, %arg0, %c0_i32_19 : i32
    %36 = arith.extui %35 : i1 to i32
    %c0_i32_20 = arith.constant 0 : i32
    %37 = arith.cmpi ne, %36, %c0_i32_20 : i32
    scf.if %37 {
      %c0_21 = arith.constant 0 : index
      %c0_22 = arith.constant 0 : index
      %38 = vector.load %arg8[%c0_21, %c0_22] : memref<8x128xf32, #tpu.memory_space<vmem>>, vector<8x128xf32>
      %39 = arith.addf %38, %31 : vector<8x128xf32>
      %c0_23 = arith.constant 0 : index
      %c0_24 = arith.constant 0 : index
      %40 = vector.load %arg8[%c0_23, %c0_24] : memref<8x128xf32, #tpu.memory_space<vmem>>, vector<8x128xf32>
      tpu.vector_store %arg8[%c0_23, %c0_24], %39 {strides = array<i32>} : memref<8x128xf32, #tpu.memory_space<vmem>>, vector<8x128xf32>,
    } else {
    }
    return
  }
  func.func @transform_0(%arg0: i32) -> (i32, i32) {
    %c0_i32 = arith.constant 0 : i32
    %c0_i32_0 = arith.constant 0 : i32
    %c0_i32_1 = arith.constant 0 : i32
    return %c0_i32, %c0_i32_0 : i32, i32
  }
  func.func @transform_1(%arg0: i32) -> (i32, i32) {
    %c0_i32 = arith.constant 0 : i32
    %c0_i32_0 = arith.constant 0 : i32
    return %c0_i32, %arg0 : i32, i32
  }
  func.func @transform_2(%arg0: i32) -> (i32, i32) {
    %c0_i32 = arith.constant 0 : i32
    %c0_i32_0 = arith.constant 0 : i32
    return %c0_i32, %arg0 : i32, i32
  }
  func.func @transform_3(%arg0: i32) -> (i32, i32) {
    %c0_i32 = arith.constant 0 : i32
    %c0_i32_0 = arith.constant 0 : i32
    return %c0_i32, %arg0 : i32, i32
  }
  func.func @transform_4(%arg0: i32) -> (i32, i32) {
    %c0_i32 = arith.constant 0 : i32
    %c0_i32_0 = arith.constant 0 : i32
    return %arg0, %c0_i32 : i32, i32
  }
  func.func @transform_5(%arg0: i32) -> (i32, i32) {
    %c0_i32 = arith.constant 0 : i32
    %c0_i32_0 = arith.constant 0 : i32
    %c0_i32_1 = arith.constant 0 : i32
    return %c0_i32, %c0_i32_0 : i32, i32
  }
  func.func @transform_6(%arg0: i32) -> (i32, i32) {
    %c0_i32 = arith.constant 0 : i32
    %c0_i32_0 = arith.constant 0 : i32
    return %c0_i32, %arg0 : i32, i32
  }
  func.func @transform_7(%arg0: i32) -> (i32, i32) {
    %c0_i32 = arith.constant 0 : i32
    %c0_i32_0 = arith.constant 0 : i32
    %c0_i32_1 = arith.constant 0 : i32
    return %c0_i32, %c0_i32_0 : i32, i32
  }
}

</mosaic_0001>

<bundles_post_ra>
// kernel: tpu_custom_call.1
= control target key start
LH: loop header
LB: loop body
LE: loop exit
PB: predicated region body
PF: predicated region fallthrough
CT: control target
= control target key end

     0   :  { %13 = vsyncpa [#allocation3], 0  ;;  %s1551_s0 = inlined_call_operand.hbm [shape: bf16[8,128], index: 0, kind: input, shape index: {}]   ;;  %s1552_s1 = inlined_call_operand.hbm [shape: bf16[128,512], index: 1, kind: input, shape index: {}]   ;;  %s1553_s2 = inlined_call_operand.hbm [shape: f32[1,512], index: 2, kind: input, shape index: {}]   ;;  %s1554_s3 = inlined_call_operand.hbm [shape: f32[1,512], index: 3, kind: input, shape index: {}]   ;;  %s1555_s4 = inlined_call_operand.hbm [shape: bf16[512,128], index: 4, kind: input, shape index: {}]   ;;  %s1556_s5 = inlined_call_operand.vmem [shape: f32[1,128], index: 5, kind: input, shape index: {}]   ;;  %s1557_s6 = inlined_call_operand.hbm [shape: f32[8,512], index: 6, kind: output, shape index: {0}]   ;;  %s1558_s7 = inlined_call_operand.hbm [shape: f32[8,128], index: 7, kind: output, shape index: {1}]  }
   0x1   :  { %14 = vsyncpa [#allocation6], 0 }
   0x2   :  { %15 = vsyncpa [#allocation9], 0 }
   0x3   :  { %16 = vsyncpa [#allocation4], 0  ;;  %s33_s26 = sshll.u32 %s1552_s1, 4  ;;  %s34_s26 = int_to_ptr.hbm [resolvable:$true] %s33_s26 }
   0x4   :  { %17 = vsyncpa [#allocation13], 0  ;;  %s1405_s27 = smov [#allocation5]   ;;  %s58_s8 = sshll.u32 %s1554_s3, 4  ;;  %s59_s8 = int_to_ptr.hbm [resolvable:$true] %s58_s8 }
   0x5   :  { %s35_s28 = sshll.u32 %s1405_s27, 4  ;;  %s1406_s9 = smov 256   ;;  %s36_s28 = int_to_ptr.vmem [resolvable:$true] %s35_s28 }
   0x6   :  { %s1407_s10 = smov 16   ;;  %s1408_s11 = smov [#allocation8]  }
   0x7   :  { %41 = dma.hbm_to_vmem [thread:$0]  %s34_s26, 4096, %s36_s28, [#allocation6], %s1406_s9, %s1406_s9, %s1407_s10  }
   0x8   :  { %s60_s12 = sshll.u32 %s1408_s11, 4  ;;  %s23_s15 = sshll.u32 %s1551_s0, 4  ;;  %s61_s12 = int_to_ptr.vmem [resolvable:$true] %s60_s12  ;;  %s24_s15 = int_to_ptr.hbm [resolvable:$true] %s23_s15 }
   0x9   :  { %63 = dma.hbm_to_vmem [thread:$0]  %s59_s8, 64, %s61_s12, [#allocation9]  }
   0xa   :  { %s47_s17 = sshll.u32 %s1553_s2, 4  ;;  %s1409_s18 = smov [#allocation2]   ;;  %s48_s17 = int_to_ptr.hbm [resolvable:$true] %s47_s17 }
   0xb   :  { %s25_s19 = sshll.u32 %s1409_s18, 4  ;;  %s1410_s3 = smov [#allocation7]   ;;  %s26_s19 = int_to_ptr.vmem [resolvable:$true] %s25_s19 }
   0xc   :  { %28 = dma.hbm_to_vmem [thread:$0]  %s24_s15, 64, %s26_s19, [#allocation3]  }
   0xd   :  { %s49_s20 = sshll.u32 %s1410_s3, 4  ;;  %s68_s23 = sshll.u32 %s1555_s4, 4  ;;  %s50_s20 = int_to_ptr.vmem [resolvable:$true] %s49_s20  ;;  %s69_s23 = int_to_ptr.hbm [resolvable:$true] %s68_s23 }
   0xe   :  { %52 = dma.hbm_to_vmem [thread:$0]  %s48_s17, 64, %s50_s20, [#allocation6]  }
   0xf   :  { %s1411_s0 = smov [#allocation10]   ;;  %s1412_s25 = smov 64  }
  0x10   :  { %s70_s24 = sshll.u32 %s1411_s0, 4  ;;  %s1413_s26 = smov 4   ;;  %s71_s24 = int_to_ptr.vmem [resolvable:$true] %s70_s24 }
  0x11   :  { %76 = dma.hbm_to_vmem [thread:$0]  %s69_s23, 4096, %s71_s24, [#allocation9], %s1412_s25, %s1412_s25, %s1413_s26  }
  0x12   :  { %1395 = dma.done.wait [#allocation3], 64  }
  0x13   :  { %1396 = vsyncadd [#allocation3], 4294967232 }
  0x14   :  { %1397 = dma.done.wait [#allocation6], 4160  }
  0x15   :  { %1398 = vsyncadd [#allocation6], 4294963136 }
  0x16   :  { %1399 = dma.done.wait [#allocation9], 4160  }
  0x17   :  { %1400 = vsyncadd [#allocation9], 4294963136  ;;  %v1001_v0 = vld [vmem:[#allocation5 + $0xe0] sm:$0xf]  ;;  %v1173_v1 = vld [vmem:[#allocation5 + $0xec] sm:$0xf0] }
  0x18   :  { %v1171_v2 = vld [vmem:[#allocation5 + $0xe4] sm:$0xf]  ;;  %v1002_v3 = vor.u32 %v1173_v1, %v1001_v0  ;;  %v1003_v4 = vld [vmem:[#allocation5 + $0xf0] sm:$0xf0]  ;;  %v1009_v5 = vld [vmem:[#allocation5 + $0xe8] sm:$0xf] }
  0x19   :  { %v1174_v6 = vld [vmem:[#allocation5 + $0xf4] sm:$0xf0]  ;;  %v1006_v7 = vor.u32 %v1171_v2, %v1003_v4  ;;  %v1172_v9 = vld [vmem:[#allocation5 + $0xec] sm:$0xf]  ;;  %v1011_v10 = vld [vmem:[#allocation5 + $0xf8] sm:$0xf0] }
  0x1a   :  { %v1010_v8 = vor.u32 %v1174_v6, %v1009_v5  ;;  %v985_v11 = vld [vmem:[#allocation5 + $0xc0] sm:$0xf]  ;;  %292 = vmatpush.bf16.msra.mxu0 %v1002_v3  ;;  %v1014_v12 = vor.u32 %v1172_v9, %v1011_v10  ;;  %v1169_v13 = vld [vmem:[#allocation5 + $0xcc] sm:$0xf0]  ;;  %v1167_v14 = vld [vmem:[#allocation5 + $0xc4] sm:$0xf] }
  0x1b   :  { %v987_v15 = vld [vmem:[#allocation5 + $0xd0] sm:$0xf0]  ;;  %305 = vmatpush.bf16.msra.mxu1 %v1006_v7  ;;  %v986_v16 = vor.u32 %v1169_v13, %v985_v11  ;;  %v993_v18 = vld [vmem:[#allocation5 + $0xc8] sm:$0xf]  ;;  %v1170_v19 = vld [vmem:[#allocation5 + $0xd4] sm:$0xf0] }
  0x1c   :  { %318 = vmatpush.bf16.msra.mxu2 %v1010_v8  ;;  %v990_v17 = vor.u32 %v1167_v14, %v987_v15  ;;  %v1168_v20 = vld [vmem:[#allocation5 + $0xcc] sm:$0xf]  ;;  %331 = vmatpush.bf16.msra.mxu3 %v1014_v12  ;;  %v994_v21 = vor.u32 %v1170_v19, %v993_v18  ;;  %v995_v22 = vld [vmem:[#allocation5 + $0xd8] sm:$0xf0]  ;;  %v969_v23 = vld [vmem:[#allocation5 + $0xa0] sm:$0xf] }
  0x1d   :  { %v1165_v24 = vld [vmem:[#allocation5 + $0xac] sm:$0xf0]  ;;  %v998_v25 = vor.u32 %v1168_v20, %v995_v22  ;;  %v1163_v26 = vld [vmem:[#allocation5 + $0xa4] sm:$0xf]  ;;  %v971_v27 = vld [vmem:[#allocation5 + $0xb0] sm:$0xf0] }
  0x1e   :  { %v977_v28 = vld [vmem:[#allocation5 + $0xa8] sm:$0xf]  ;;  %293 = vmatpush.bf16.msra.mxu0 %v986_v16  ;;  %v970_v29 = vor.u32 %v1165_v24, %v969_v23  ;;  %v1166_v30 = vld [vmem:[#allocation5 + $0xb4] sm:$0xf0]  ;;  %v1164_v31 = vld [vmem:[#allocation5 + $0xac] sm:$0xf]  ;;  %v974_v33 = vor.u32 %v1163_v26, %v971_v27 }
  0x1f   :  { %v979_v32 = vld [vmem:[#allocation5 + $0xb8] sm:$0xf0]  ;;  %306 = vmatpush.bf16.msra.mxu1 %v990_v17  ;;  %v978_v34 = vor.u32 %v1166_v30, %v977_v28  ;;  %v953_v35 = vld [vmem:[#allocation5 + $0x80] sm:$0xf]  ;;  %v1161_v36 = vld [vmem:[#allocation5 + $0x8c] sm:$0xf0] }
  0x20   :  { %319 = vmatpush.bf16.msra.mxu2 %v994_v21  ;;  %v1159_v37 = vld [vmem:[#allocation5 + $0x84] sm:$0xf]  ;;  %332 = vmatpush.bf16.msra.mxu3 %v998_v25  ;;  %v982_v38 = vor.u32 %v1164_v31, %v979_v32  ;;  %v955_v39 = vld [vmem:[#allocation5 + $0x90] sm:$0xf0]  ;;  %v961_v40 = vld [vmem:[#allocation5 + $0x88] sm:$0xf]  ;;  %v954_v44 = vor.u32 %v1161_v36, %v953_v35 }
  0x21   :  { %v1162_v41 = vld [vmem:[#allocation5 + $0x94] sm:$0xf0]  ;;  %v1160_v42 = vld [vmem:[#allocation5 + $0x8c] sm:$0xf]  ;;  %v963_v43 = vld [vmem:[#allocation5 + $0x98] sm:$0xf0]  ;;  %v958_v45 = vor.u32 %v1159_v37, %v955_v39 }
  0x22   :  { %294 = vmatpush.bf16.msra.mxu0 %v970_v29  ;;  %v962_v46 = vor.u32 %v1162_v41, %v961_v40  ;;  %v937_v47 = vld [vmem:[#allocation5 + $0x60] sm:$0xf]  ;;  %v1157_v48 = vld [vmem:[#allocation5 + $0x6c] sm:$0xf0]  ;;  %v1155_v49 = vld [vmem:[#allocation5 + $0x64] sm:$0xf]  ;;  %v966_v50 = vor.u32 %v1160_v42, %v963_v43 }
  0x23   :  { %307 = vmatpush.bf16.msra.mxu1 %v974_v33  ;;  %v939_v51 = vld [vmem:[#allocation5 + $0x70] sm:$0xf0]  ;;  %v945_v52 = vld [vmem:[#allocation5 + $0x68] sm:$0xf]  ;;  %v1158_v53 = vld [vmem:[#allocation5 + $0x74] sm:$0xf0]  ;;  %v938_v56 = vor.u32 %v1157_v48, %v937_v47 }
  0x24   :  { %320 = vmatpush.bf16.msra.mxu2 %v978_v34  ;;  %333 = vmatpush.bf16.msra.mxu3 %v982_v38  ;;  %v1156_v54 = vld [vmem:[#allocation5 + $0x6c] sm:$0xf]  ;;  %v947_v55 = vld [vmem:[#allocation5 + $0x78] sm:$0xf0]  ;;  %v942_v57 = vor.u32 %v1155_v49, %v939_v51  ;;  %v946_v58 = vor.u32 %v1158_v53, %v945_v52  ;;  %v921_v59 = vld [vmem:[#allocation5 + $0x40] sm:$0xf] }
  0x25   :  { %v1153_v60 = vld [vmem:[#allocation5 + $0x4c] sm:$0xf0]  ;;  %v1151_v61 = vld [vmem:[#allocation5 + $0x44] sm:$0xf]  ;;  %v950_v62 = vor.u32 %v1156_v54, %v947_v55  ;;  %v923_v63 = vld [vmem:[#allocation5 + $0x50] sm:$0xf0] }
  0x26   :  { %295 = vmatpush.bf16.msra.mxu0 %v954_v44  ;;  %v929_v0 = vld [vmem:[#allocation5 + $0x48] sm:$0xf]  ;;  %v1154_v1 = vld [vmem:[#allocation5 + $0x54] sm:$0xf0]  ;;  %v1152_v2 = vld [vmem:[#allocation5 + $0x4c] sm:$0xf]  ;;  %v922_v4 = vor.u32 %v1153_v60, %v921_v59  ;;  %v926_v6 = vor.u32 %v1151_v61, %v923_v63 }
  0x27   :  { %308 = vmatpush.bf16.msra.mxu1 %v958_v45  ;;  %v931_v3 = vld [vmem:[#allocation5 + $0x58] sm:$0xf0]  ;;  %v905_v5 = vld [vmem:[#allocation5 + $0x20] sm:$0xf]  ;;  %v930_v7 = vor.u32 %v1154_v1, %v929_v0  ;;  %v1149_v8 = vld [vmem:[#allocation5 + $0x2c] sm:$0xf0] }
  0x28   :  { %321 = vmatpush.bf16.msra.mxu2 %v962_v46  ;;  %334 = vmatpush.bf16.msra.mxu3 %v966_v50  ;;  %v1147_v9 = vld [vmem:[#allocation5 + $0x24] sm:$0xf]  ;;  %v907_v10 = vld [vmem:[#allocation5 + $0x30] sm:$0xf0]  ;;  %v934_v11 = vor.u32 %v1152_v2, %v931_v3  ;;  %v913_v12 = vld [vmem:[#allocation5 + $0x28] sm:$0xf]  ;;  %v906_v16 = vor.u32 %v1149_v8, %v905_v5 }
  0x29   :  { %v1150_v13 = vld [vmem:[#allocation5 + $0x34] sm:$0xf0]  ;;  %v1148_v14 = vld [vmem:[#allocation5 + $0x2c] sm:$0xf]  ;;  %v915_v15 = vld [vmem:[#allocation5 + $0x38] sm:$0xf0]  ;;  %v910_v17 = vor.u32 %v1147_v9, %v907_v10 }
  0x2a   :  { %296 = vmatpush.bf16.msra.mxu0 %v938_v56  ;;  %v914_v18 = vor.u32 %v1150_v13, %v913_v12  ;;  %v889_v19 = vld [vmem:[#allocation5] sm:$0xf]  ;;  %v1145_v20 = vld [vmem:[#allocation5 + $0xc] sm:$0xf0]  ;;  %v1143_v21 = vld [vmem:[#allocation5 + $0x4] sm:$0xf]  ;;  %v918_v22 = vor.u32 %v1148_v14, %v915_v15 }
  0x2b   :  { %309 = vmatpush.bf16.msra.mxu1 %v942_v57  ;;  %v891_v23 = vld [vmem:[#allocation5 + $0x10] sm:$0xf0]  ;;  %v897_v24 = vld [vmem:[#allocation5 + $0x8] sm:$0xf]  ;;  %v1146_v25 = vld [vmem:[#allocation5 + $0x14] sm:$0xf0]  ;;  %v890_v28 = vor.u32 %v1145_v20, %v889_v19 }
  0x2c   :  { %322 = vmatpush.bf16.msra.mxu2 %v946_v58  ;;  %335 = vmatpush.bf16.msra.mxu3 %v950_v62  ;;  %v1144_v26 = vld [vmem:[#allocation5 + $0xc] sm:$0xf]  ;;  %v899_v27 = vld [vmem:[#allocation5 + $0x18] sm:$0xf0]  ;;  %v894_v29 = vor.u32 %v1143_v21, %v891_v23  ;;  %v898_v30 = vor.u32 %v1146_v25, %v897_v24  ;;  %v1182_v47 = vld [vmem:[#allocation10 + $0x38] sm:$0xff]  ;;  %vm464_vm10 = vcmask 1040384  }
  0x2d   :  { %v902_v31 = vor.u32 %v1144_v26, %v899_v27  ;;  %v99_v32 = vld [vmem:[#allocation2] sm:$0xf]  ;;  %v1190_v48 = vld [vmem:[#allocation10 + $0x78] sm:$0xff]  ;;  %v1180_v25 = vld [vmem:[#allocation10 + $0x28] sm:$0xff]  ;;  %vm466_vm12 = vcmask 1042434   ;;  %vm468_vm14 = vcmask 1041408  }
  0x2e   :  { %297 = vmatpush.bf16.msra.mxu0 %v922_v4  ;;  %v1198_v49 = vld [vmem:[#allocation10 + $0xb8] sm:$0xff]  ;;  %v1181_v5 = vld [vmem:[#allocation10 + $0x30] sm:$0xff]  ;;  %v1188_v26 = vld [vmem:[#allocation10 + $0x68] sm:$0xff]  ;;  %s1414_s2 = smov [#allocation11]   ;;  %s859_s29 = sshll.u32 %s1557_s6, 4  ;;  %s860_s29 = int_to_ptr.hbm [resolvable:$true] %s859_s29 }
  0x2f   :  { %310 = vmatpush.bf16.msra.mxu1 %v926_v6  ;;  %v1206_v53 = vld [vmem:[#allocation10 + $0xf8] sm:$0xff]  ;;  %v1189_v6 = vld [vmem:[#allocation10 + $0x70] sm:$0xff]  ;;  %s857_s4 = sshll.u32 %s1414_s2, 4  ;;  %s1415_s9 = smov [#allocation12]   ;;  %s858_s4 = int_to_ptr.vmem [resolvable:$true] %s857_s4 }
  0x30   :  { %323 = vmatpush.bf16.msra.mxu2 %v930_v7  ;;  %336 = vmatpush.bf16.msra.mxu3 %v934_v11  ;;  %v1197_v7 = vld [vmem:[#allocation10 + $0xb0] sm:$0xff]  ;;  %s868_s10 = sshll.u32 %s1415_s9, 4  ;;  %s870_s6 = sshll.u32 %s1558_s7, 4  ;;  %s869_s10 = int_to_ptr.vmem [resolvable:$true] %s868_s10  ;;  %s871_s6 = int_to_ptr.hbm [resolvable:$true] %s870_s6 }
  0x31   :  { %v1205_v12 = vld [vmem:[#allocation10 + $0xf0] sm:$0xff] }
  0x32   :  { %298 = vmatpush.bf16.msra.mxu0 %v906_v16 }
  0x33   :  { %311 = vmatpush.bf16.msra.mxu1 %v910_v17 }
  0x34   :  { %324 = vmatpush.bf16.msra.mxu2 %v914_v18  ;;  %337 = vmatpush.bf16.msra.mxu3 %v918_v22 }
  0x36   :  { %299 = vmatpush.bf16.msra.mxu0 %v890_v28 }
  0x37   :  { %312 = vmatpush.bf16.msra.mxu1 %v894_v29 }
  0x38   :  { %325 = vmatpush.bf16.msra.mxu2 %v898_v30  ;;  %338 = vmatpush.bf16.msra.mxu3 %v902_v31 }
  0x39   :  { %300 = vmatmul.bf16.vlgmr.msra.gmra.mxu0 %v99_v32 }
  0x3a   :  { %313 = vmatmul.bf16.vlgmr.msra.gmra.mxu1 %v99_v32  ;;  %783 = vmatpush.bf16.msrb.mxu0 %v1182_v47  ;;  %v1179_v47 = vld [vmem:[#allocation10 + $0x20] sm:$0xff] }
  0x3b   :  { %326 = vmatmul.bf16.vlgmr.msra.gmra.mxu2 %v99_v32  ;;  %339 = vmatmul.bf16.vlgmr.msra.gmra.mxu3 %v99_v32  ;;  %v1196_v32 = vld [vmem:[#allocation10 + $0xa8] sm:$0xff] }
  0x3c   :  { %796 = vmatpush.bf16.msrb.mxu1 %v1190_v48  ;;  %809 = vmatpush.bf16.msrb.mxu2 %v1198_v49  ;;  %v1187_v48 = vld [vmem:[#allocation10 + $0x60] sm:$0xff] }
  0x3d   :  { %822 = vmatpush.bf16.msrb.mxu3 %v1206_v53  ;;  %v1195_v49 = vld [vmem:[#allocation10 + $0xa0] sm:$0xff] }
  0x3e   :  { %784 = vmatpush.bf16.msrb.mxu0 %v1181_v5 }
  0x40   :  { %797 = vmatpush.bf16.msrb.mxu1 %v1189_v6  ;;  %810 = vmatpush.bf16.msrb.mxu2 %v1197_v7 }
  0x41   :  { %823 = vmatpush.bf16.msrb.mxu3 %v1205_v12 }
  0x42   :  { %785 = vmatpush.bf16.msrb.mxu0 %v1180_v25  ;;  %v1175_v25 = vld [vmem:[#allocation10] sm:$0xff] }
  0x44   :  { %798 = vmatpush.bf16.msrb.mxu1 %v1188_v26  ;;  %811 = vmatpush.bf16.msrb.mxu2 %v1196_v32  ;;  %v1183_v26 = vld [vmem:[#allocation10 + $0x40] sm:$0xff] }
  0x46   :  { %786 = vmatpush.bf16.msrb.mxu0 %v1179_v47 }
  0x48   :  { %799 = vmatpush.bf16.msrb.mxu1 %v1187_v48  ;;  %812 = vmatpush.bf16.msrb.mxu2 %v1195_v49 }
  0xb6   :  { %v1471_v33 = vpop.f32.mrf.mxu0 }
  0xb7   :  { %v344_v34 = vrot.slane %v1471_v33, 4  ;;  %v368_v35 = vmul.f32 %v1471_v33, %v1471_v33  ;;  %v1476_v36 = vpop.f32.mrf.mxu1 }
  0xb8   :  { %v350_v37 = vrot.slane %v1476_v36, 4  ;;  %v369_v38 = vmul.f32 %v1476_v36, %v1476_v36 }
  0xb9   :  { %v345_v39 = vadd.f32 %v344_v34, %v1471_v33  ;;  %v372_v40 = vrot.slane %v368_v35, 4  ;;  %v1204_v34 = vld [vmem:[#allocation10 + $0xe8] sm:$0xff] }
  0xba   :  { %v351_v41 = vadd.f32 %v350_v37, %v1476_v36  ;;  %v378_v42 = vrot.slane %v369_v38, 4  ;;  %824 = vmatpush.bf16.msrb.mxu3 %v1204_v34 }
  0xbb   :  { %v346_v43 = vrot.slane %v345_v39, 2  ;;  %v373_v44 = vadd.f32 %v372_v40, %v368_v35 }
  0xbc   :  { %v352_v45 = vrot.slane %v351_v41, 2  ;;  %v379_v46 = vadd.f32 %v378_v42, %v369_v38 }
  0xbd   :  { %v347_v50 = vadd.f32 %v346_v43, %v345_v39  ;;  %v374_v51 = vrot.slane %v373_v44, 2 }
  0xbe   :  { %v1483_v52 = vpop.f32.mrf.mxu2  ;;  %v353_v54 = vadd.f32 %v352_v45, %v351_v41  ;;  %v380_v55 = vrot.slane %v379_v46, 2  ;;  %v1488_v58 = vpop.f32.mrf.mxu3 }
  0xbf   :  { %v356_v56 = vrot.slane %v1483_v52, 4  ;;  %v370_v57 = vmul.f32 %v1483_v52, %v1483_v52  ;;  %v303_v59 = vpop.f32.mrf.mxu0  ;;  %v348_v60 = vrot.slane %v347_v50, 1  ;;  %v375_v61 = vadd.f32 %v374_v51, %v373_v44  ;;  %v316_v0 = vpop.f32.mrf.mxu1 }
  0xc0   :  { %v362_v62 = vrot.slane %v1488_v58, 4  ;;  %v371_v63 = vmul.f32 %v1488_v58, %v1488_v58  ;;  %v354_v1 = vrot.slane %v353_v54, 1  ;;  %v381_v2 = vadd.f32 %v380_v55, %v379_v46  ;;  %v1186_v0 = vld [vmem:[#allocation10 + $0x58] sm:$0xff] }
  0xc1   :  { %v357_v3 = vadd.f32 %v356_v56, %v1483_v52  ;;  %v384_v4 = vrot.slane %v370_v57, 4  ;;  %v349_v8 = vadd.f32 %v348_v60, %v347_v50  ;;  %v376_v9 = vrot.slane %v375_v61, 1  ;;  %800 = vmatpush.bf16.msrb.mxu1 %v1186_v0 }
  0xc2   :  { %v363_v10 = vadd.f32 %v362_v62, %v1488_v58  ;;  %v390_v11 = vrot.slane %v371_v63, 4  ;;  %v355_v13 = vadd.f32 %v354_v1, %v353_v54  ;;  %v382_v14 = vrot.slane %v381_v2, 1  ;;  %v1203_v54 = vld [vmem:[#allocation10 + $0xe0] sm:$0xff]  ;;  %v1194_v1 = vld [vmem:[#allocation10 + $0x98] sm:$0xff] }
  0xc3   :  { %v358_v15 = vrot.slane %v357_v3, 2  ;;  %v385_v16 = vadd.f32 %v384_v4, %v370_v57  ;;  %v377_v17 = vadd.f32 %v376_v9, %v375_v61  ;;  %v1495_v18 = vmul.f32 0.125, %v349_v8  ;;  %825 = vmatpush.bf16.msrb.mxu3 %v1203_v54  ;;  %v1202_v4 = vld [vmem:[#allocation10 + $0xd8] sm:$0xff]  ;;  %813 = vmatpush.bf16.msrb.mxu2 %v1194_v1  ;;  %v1177_v8 = vld [vmem:[#allocation10 + $0x10] sm:$0xff] }
  0xc4   :  { %v364_v19 = vrot.slane %v363_v10, 2  ;;  %v391_v20 = vadd.f32 %v390_v11, %v371_v63  ;;  %v383_v21 = vadd.f32 %v382_v14, %v381_v2  ;;  %v1497_v22 = vmul.f32 0.125, %v355_v13  ;;  %v1178_v63 = vld [vmem:[#allocation10 + $0x18] sm:$0xff]  ;;  %v1185_v9 = vld [vmem:[#allocation10 + $0x50] sm:$0xff] }
  0xc5   :  { %v359_v23 = vadd.f32 %v358_v15, %v357_v3  ;;  %v386_v24 = vrot.slane %v385_v16, 2  ;;  %v400_v27 = vmul.f32 0.125, %v377_v17  ;;  %v404_v28 = vmul.f32 %v1495_v18, %v1495_v18  ;;  %787 = vmatpush.bf16.msrb.mxu0 %v1178_v63  ;;  %v1201_v13 = vld [vmem:[#allocation10 + $0xd0] sm:$0xff]  ;;  %801 = vmatpush.bf16.msrb.mxu1 %v1185_v9  ;;  %v1184_v17 = vld [vmem:[#allocation10 + $0x48] sm:$0xff] }
  0xc6   :  { %v365_v29 = vadd.f32 %v364_v19, %v363_v10  ;;  %v392_v30 = vrot.slane %v391_v20, 2  ;;  %v329_v31 = vpop.f32.mrf.mxu2  ;;  %v401_v35 = vmul.f32 0.125, %v383_v21  ;;  %v405_v37 = vmul.f32 %v1497_v22, %v1497_v22  ;;  %v342_v40 = vpop.f32.mrf.mxu3  ;;  %v1193_v10 = vld [vmem:[#allocation10 + $0x90] sm:$0xff]  ;;  %v1200_v21 = vld [vmem:[#allocation10 + $0xc8] sm:$0xff] }
  0xc7   :  { %v360_v38 = vrot.slane %v359_v23, 1  ;;  %v387_v39 = vadd.f32 %v386_v24, %v385_v16  ;;  %v408_v41 = vsub.f32 %v400_v27, %v404_v28  ;;  %826 = vmatpush.bf16.msrb.mxu3 %v1202_v4  ;;  %v1176_v16 = vld [vmem:[#allocation10 + $0x8] sm:$0xff]  ;;  %814 = vmatpush.bf16.msrb.mxu2 %v1193_v10  ;;  %v1191_v28 = vld [vmem:[#allocation10 + $0x80] sm:$0xff] }
  0xc8   :  { %v366_v42 = vrot.slane %v365_v29, 1  ;;  %v393_v43 = vadd.f32 %v392_v30, %v391_v20  ;;  %v409_v44 = vsub.f32 %v401_v35, %v405_v37  ;;  %v1192_v20 = vld [vmem:[#allocation10 + $0x88] sm:$0xff] }
  0xc9   :  { %v361_v45 = vadd.f32 %v360_v38, %v359_v23  ;;  %v388_v46 = vrot.slane %v387_v39, 1  ;;  %v1503_v50 = vadd.f32 1e-05, %v408_v41  ;;  %788 = vmatpush.bf16.msrb.mxu0 %v1177_v8  ;;  %802 = vmatpush.bf16.msrb.mxu1 %v1184_v17 }
  0xca   :  { %v367_v51 = vadd.f32 %v366_v42, %v365_v29  ;;  %v394_v53 = vrot.slane %v393_v43, 1  ;;  %v1505_v55 = vadd.f32 1e-05, %v409_v44  ;;  %v1199_v29 = vld [vmem:[#allocation10 + $0xc0] sm:$0xff] }
  0xcb   :  { %v389_v56 = vadd.f32 %v388_v46, %v387_v39  ;;  %v1507_v57 = vmul.f32 0.125, %v361_v45  ;;  %1219 = vrsqrt.f32 %v1503_v50  ;;  %827 = vmatpush.bf16.msrb.mxu3 %v1201_v13  ;;  %815 = vmatpush.bf16.msrb.mxu2 %v1192_v20  ;;  %vm422_vm11 = vweird.f32 %v1503_v50  ;;  %v472_v13 = vld [vmem:[#allocation8] sm:$0xf] }
  0xcc   :  { %v395_v59 = vadd.f32 %v394_v53, %v393_v43  ;;  %v1510_v60 = vmul.f32 0.125, %v367_v51  ;;  %1221 = vrsqrt.f32 %v1505_v55  ;;  %vm432_vm1 = vweird.f32 %v1505_v55 }
  0xcd   :  { %v402_v61 = vmul.f32 0.125, %v389_v56  ;;  %v406_v62 = vmul.f32 %v1507_v57, %v1507_v57  ;;  %789 = vmatpush.bf16.msrb.mxu0 %v1176_v16  ;;  %803 = vmatpush.bf16.msrb.mxu1 %v1183_v26 }
  0xce   :  { %v403_v2 = vmul.f32 0.125, %v395_v59  ;;  %v407_v3 = vmul.f32 %v1510_v60, %v1510_v60 }
  0xcf   :  { %v410_v5 = vsub.f32 %v402_v61, %v406_v62  ;;  %828 = vmatpush.bf16.msrb.mxu3 %v1200_v21  ;;  %816 = vmatpush.bf16.msrb.mxu2 %v1191_v28  ;;  %v456_v61 = vld [vmem:[#allocation7] sm:$0xf] }
  0xd0   :  { %v411_v6 = vsub.f32 %v403_v2, %v407_v3 }
  0xd1   :  { %v414_v7 = vadd.f32 1e-05, %v410_v5  ;;  %v1517_v11 = vpop.eup %1219  ;;  %790 = vmatpush.bf16.msrb.mxu0 %v1175_v25 }
  0xd2   :  { %v415_v12 = vadd.f32 1e-05, %v411_v6  ;;  %v1222_v14 = vpop.eup %1221  ;;  %v417_v15 = vmul.f32 %v1517_v11, %v1503_v50  ;;  %vm423_vm6 = vweird.f32 %v1517_v11 }
  0xd3   :  { %1223 = vrsqrt.f32 %v414_v7  ;;  %v427_v19 = vmul.f32 %v1222_v14, %v1505_v55  ;;  %829 = vmatpush.bf16.msrb.mxu3 %v1199_v29  ;;  %vm433_vm0 = vweird.f32 %v1222_v14  ;;  %vm442_vm5 = vweird.f32 %v414_v7  ;;  %vm424_vm13 = vmor %vm422_vm11, %vm423_vm6 }
  0xd4   :  { %1225 = vrsqrt.f32 %v415_v12  ;;  %v418_v24 = vmul.f32 %v1517_v11, %v417_v15  ;;  %vm434_vm2 = vmor %vm432_vm1, %vm433_vm0  ;;  %vm452_vm8 = vweird.f32 %v415_v12 }
  0xd5   :  { %v428_v23 = vmul.f32 %v1222_v14, %v427_v19 }
  0xd6   :  { %v419_v35 = vmul.f32 0.5, %v418_v24 }
  0xd7   :  { %v429_v27 = vmul.f32 0.5, %v428_v23 }
  0xd8   :  { %v420_v42 = vsub.f32 1.5, %v419_v35 }
  0xd9   :  { %v1224_v30 = vpop.eup %1223  ;;  %v430_v32 = vsub.f32 1.5, %v429_v27 }
  0xda   :  { %v1226_v31 = vpop.eup %1225  ;;  %v437_v34 = vmul.f32 %v1224_v30, %v414_v7  ;;  %vm443_vm3 = vweird.f32 %v1224_v30  ;;  %v421_v48 = vmul.f32 %v1517_v11, %v420_v42 }
  0xdb   :  { %v447_v37 = vmul.f32 %v1226_v31, %v415_v12  ;;  %v431_v39 = vmul.f32 %v1222_v14, %v430_v32  ;;  %vm453_vm4 = vweird.f32 %v1226_v31  ;;  %vm444_vm7 = vmor %vm442_vm5, %vm443_vm3 }
  0xdc   :  { %v438_v38 = vmul.f32 %v1224_v30, %v437_v34  ;;  %vm454_vm9 = vmor %vm452_vm8, %vm453_vm4  ;;  %v425_v59 = vsel %vm424_vm13, %v1517_v11, %v421_v48 }
  0xdd   :  { %v448_v40 = vmul.f32 %v1226_v31, %v447_v37  ;;  %v435_v45 = vsel %vm434_vm2, %v1222_v14, %v431_v39  ;;  %v1218_v39 = vld [vmem:[%s1556_s5] ss:$0 sm:$0xff] }
  0xde   :  { %v439_v41 = vmul.f32 0.5, %v438_v38  ;;  %v461_v51 = vrot.slane %v435_v45, 7 }
  0xdf   :  { %v449_v43 = vmul.f32 0.5, %v448_v40 }
  0xe0   :  { %v440_v44 = vsub.f32 1.5, %v439_v41  ;;  %v465_v62 = vsel %vm464_vm10, %v425_v59, %v461_v51 }
  0xe1   :  { %v450_v46 = vsub.f32 1.5, %v449_v43 }
  0xe2   :  { %v441_v47 = vmul.f32 %v1224_v30, %v440_v44 }
  0xe3   :  { %v451_v49 = vmul.f32 %v1226_v31, %v450_v46 }
  0xe4   :  { %v445_v53 = vsel %vm444_vm7, %v1224_v30, %v441_v47 }
  0xe5   :  { %v462_v54 = vrot.slane %v445_v53, 6  ;;  %v455_v55 = vsel %vm454_vm9, %v1226_v31, %v451_v49 }
  0xe6   :  { %v463_v56 = vrot.slane %v455_v55, 5 }
  0xe8   :  { %v467_v63 = vsel %vm466_vm12, %v462_v54, %v463_v56 }
  0xe9   :  { %v469_v0 = vsel %vm468_vm14, %v465_v62, %v467_v63 }
  0xea   :  { %v471_v1 = vmul.f32 %v469_v0, %v456_v61 }
  0xec   :  { %v475_v2 = vperm.slane %v471_v1, 1  ;;  %v476_v3 = vperm.slane %v471_v1, 2  ;;  %v477_v4 = vperm.slane %v471_v1, 3  ;;  %v474_v50 = vperm.slane %v471_v1, 0 }
  0xee   :  { %v484_v5 = vmul.f32 %v476_v3, %v1507_v57  ;;  %v485_v6 = vmul.f32 %v477_v4, %v1510_v60  ;;  %v483_v7 = vmul.f32 %v475_v2, %v1497_v22  ;;  %v482_v10 = vmul.f32 %v474_v50, %v1495_v18 }
  0xef   :  { %v501_v17 = vmul.f32 %v477_v4, %v1488_v58  ;;  %v498_v57 = vmul.f32 %v474_v50, %v1471_v33  ;;  %v499_v60 = vmul.f32 %v475_v2, %v1476_v36  ;;  %v500_v22 = vmul.f32 %v476_v3, %v1483_v52 }
  0xf0   :  { %v491_v8 = vrot.slane %v484_v5, 6  ;;  %v492_v9 = vrot.slane %v485_v6, 5  ;;  %v490_v11 = vrot.slane %v483_v7, 7 }
  0xf2   :  { %v494_v12 = vsel %vm466_vm12, %v491_v8, %v492_v9  ;;  %v493_v14 = vsel %vm464_vm10, %v482_v10, %v490_v11 }
  0xf3   :  { %v495_v15 = vsel %vm468_vm14, %v493_v14, %v494_v12 }
  0xf4   :  { %v497_v16 = vsub.f32 %v472_v13, %v495_v15 }
  0xf6   :  { %v503_v19 = vperm.slane %v497_v16, 0  ;;  %v504_v20 = vperm.slane %v497_v16, 1  ;;  %v505_v18 = vperm.slane %v497_v16, 2  ;;  %v506_v21 = vperm.slane %v497_v16, 3 }
  0xf8   :  { %v511_v23 = vadd.f32 %v503_v19, %v498_v57  ;;  %v512_v24 = vadd.f32 %v504_v20, %v499_v60  ;;  %v513_v25 = vadd.f32 %v505_v18, %v500_v22  ;;  %v514_v26 = vadd.f32 %v506_v21, %v501_v17 }
  0xfa   :  { %v515_v27 = vmax.f32 %v511_v23, 0.0  ;;  %v516_v28 = vmax.f32 %v512_v24, 0.0  ;;  %v517_v29 = vmax.f32 %v513_v25, 0.0  ;;  %v518_v30 = vmax.f32 %v514_v26, 0.0 }
  0xfc   :  { %519 = vst [vmem:[#allocation11] sm:$0xff] %v515_v27  ;;  %v523_v58 = vpack.c.bf16 %v515_v27, %v515_v27  ;;  %v524_v31 = vpack.c.bf16 %v516_v28, %v516_v28  ;;  %v525_v33 = vpack.c.bf16 %v517_v29, %v517_v29  ;;  %v526_v32 = vpack.c.bf16 %v518_v30, %v518_v30 }
  0xfd   :  { %520 = vst [vmem:[#allocation11 + $0x8] sm:$0xff] %v516_v28 }
  0xfe   :  { %791 = vmatmul.bf16.vlgmr.msrb.gmra.mxu0 %v523_v58  ;;  %804 = vmatmul.bf16.vlgmr.msrb.gmra.mxu1 %v524_v31  ;;  %521 = vst [vmem:[#allocation11 + $0x10] sm:$0xff] %v517_v29 }
  0xff   :  { %817 = vmatmul.bf16.vlgmr.msrb.gmra.mxu2 %v525_v33  ;;  %522 = vst [vmem:[#allocation11 + $0x18] sm:$0xff] %v518_v30  ;;  %830 = vmatmul.bf16.vlgmr.msrb.gmra.mxu3 %v526_v32 }
 0x100   :  { %862 = dma.vmem_to_hbm [thread:$0]  %s858_s4, 512, %s860_s29, [#allocation4]  }
 0x17b   :  { %v792_v36 = vpop.f32.mrf.mxu0  ;;  %v805_v52 = vpop.f32.mrf.mxu1 }
 0x17c   :  { %v806_v34 = vadd.f32 %v805_v52, %v792_v36 }
 0x182   :  { %v818_v35 = vpop.f32.mrf.mxu2  ;;  %v831_v37 = vpop.f32.mrf.mxu3 }
 0x183   :  { %v819_v38 = vadd.f32 %v818_v35, %v806_v34  ;;  %v794_v40 = vpop.f32.mrf.mxu0  ;;  %v807_v41 = vpop.f32.mrf.mxu1 }
 0x185   :  { %v832_v42 = vadd.f32 %v831_v37, %v819_v38 }
 0x187   :  { %v843_v43 = vadd.f32 %v1218_v39, %v832_v42 }
 0x189   :  { %844 = vst [vmem:[#allocation12] sm:$0xff] %v843_v43 }
 0x18a   :  { %v820_v44 = vpop.f32.mrf.mxu2  ;;  %v833_v45 = vpop.f32.mrf.mxu3  ;;  %873 = dma.vmem_to_hbm [thread:$0]  %s869_s10, 128, %s871_s6, [#allocation13]  }
 0x18b   :  { %1401 = dma.done.wait [#allocation4], 512  }
 0x18c   :  { %1402 = vsyncadd [#allocation4], 4294966784 }
 0x18d   :  { %1403 = dma.done.wait [#allocation13], 128  }
 0x18e   :  { %1404 = vsyncadd [#allocation13], 4294967168 }
 0x18f   :  { %882 = vsyncpa [#allocation3], 1 }
 0x190   :  { %883 = vsyncpa [#allocation6], 1 }
 0x191   :  { %884 = vsyncpa [#allocation9], 1 }
 0x192   :  { %885 = vsyncpa [#allocation4], 1 }
 0x193   :  { %886 = vsyncpa [#allocation13], 1 }

</bundles_post_ra>
